<compile_context>
chip_gen: v5e
topology: v5e:2x2
jax: 0.10.0
libtpu: 0.0.40
codegen_flags: <defaults>
</compile_context>

<pallas_src>
import functools

import jax
import jax.numpy as jnp
from jax.experimental import pallas as pl
from jax.experimental.pallas import tpu as pltpu

_EPS = 1e-6  # F.pairwise_distance default eps


def _binary_loss_kernel(q_ref, p_ref, n_ref, o_ref, *, margin):
    q = q_ref[...].astype(jnp.float32)
    p = p_ref[...].astype(jnp.float32)
    n = n_ref[...].astype(jnp.float32)

    # pairwise_distance adds eps to the difference before taking the norm.
    dp = q - p + _EPS
    dn = q - n + _EPS

    # Positive term: d_pos**2 == raw sum of squares (no sqrt->square round trip).
    pos_sq = jnp.sum(dp * dp, axis=-1, keepdims=True)   # (tb, 1)
    neg_sq = jnp.sum(dn * dn, axis=-1, keepdims=True)   # (tb, 1)

    d_neg = jnp.sqrt(neg_sq)
    hinge = jnp.maximum(margin - d_neg, 0.0)
    o_ref[...] = pos_sq + hinge * hinge                  # (tb, 1)


def _default_vmem_limit_bytes():
    cap = None
    try:
        info = pltpu.get_tpu_info()
        cap = getattr(info, "vmem_capacity_bytes", None)
    except Exception:
        cap = None
    if not cap:
        return 48 * 1024 * 1024        # safe on every generation (incl. v7x)
    # Leave headroom: v5e/v6e (128 MiB) -> 64 MiB; v7x (64 MiB) -> 48 MiB.
    return int(min(64 * 1024 * 1024, (3 * cap) // 4))


def binary_loss(query, positive, negative, margin=1.0,
                vmem_limit_bytes=None, max_block_rows=32768):
    """query/positive/negative: (B, D) arrays. Returns (B,) float32 loss."""
    B, D = query.shape
    assert positive.shape == (B, D) and negative.shape == (B, D)

    if vmem_limit_bytes is None:
        vmem_limit_bytes = _default_vmem_limit_bytes()

    itemsize = jnp.dtype(query.dtype).itemsize

    # VMEM per row of tile: 3 input streams x 2 pipeline buffers, plus ~3
    # (tb, D) f32 in-kernel temporaries (upcasts / diffs / squares).
    bytes_per_row = 3 * 2 * D * itemsize + 3 * D * 4
    budget = int(0.75 * vmem_limit_bytes)
    tb = budget // max(1, bytes_per_row)
    tb = min(tb, max_block_rows)
    tb = max(8, (tb // 8) * 8)

    if tb >= B:
        # One block covers the whole batch (full-extent block dims are allowed
        # even when B % 8 != 0).  If that single step would still move a few
        # MB, split in two so multi-TC chips can shard the "parallel" axis.
        tb = B
        half = -(-B // 2)
        half = -(-half // 8) * 8
        if 0 < half < B and 3 * half * D * itemsize >= (2 << 20):
            tb = half

    grid_b = pl.cdiv(B, tb)

    kernel = functools.partial(_binary_loss_kernel, margin=float(margin))

    cost = pl.CostEstimate(
        flops=10 * B * D,
        transcendentals=B,
        bytes_accessed=3 * B * D * itemsize + 4 * B,
    )

    out = pl.pallas_call(
        kernel,
        out_shape=jax.ShapeDtypeStruct((B, 1), jnp.float32),
        grid=(grid_b,),
        in_specs=[
            pl.BlockSpec((tb, D), lambda i: (i, 0)),
            pl.BlockSpec((tb, D), lambda i: (i, 0)),
            pl.BlockSpec((tb, D), lambda i: (i, 0)),
        ],
        out_specs=pl.BlockSpec((tb, 1), lambda i: (i, 0)),
        compiler_params=pltpu.CompilerParams(
            dimension_semantics=("parallel",),
            vmem_limit_bytes=int(vmem_limit_bytes),
        ),
        cost_estimate=cost,
    )(query, positive, negative)

    return out[:, 0]


def _reference(query, positive, negative, margin=1.0):
    d_pos = jnp.linalg.norm(query - positive + _EPS, axis=-1)
    d_neg = jnp.linalg.norm(query - negative + _EPS, axis=-1)
    hinge = jnp.maximum(margin - d_neg, 0.0)
    return d_pos ** 2 + hinge ** 2


if __name__ == "__main__":
    key = jax.random.PRNGKey(0)
    k1, k2, k3 = jax.random.split(key, 3)

    # Case 1: f32 inputs, batch NOT a multiple of 8 (exercises the no-pad,
    # ragged-block path that the review asked to lock in).
    B, D = 20, 128
    q = jax.random.normal(k1, (B, D), dtype=jnp.float32)
    p = jax.random.normal(k2, (B, D), dtype=jnp.float32)
    n = jax.random.normal(k3, (B, D), dtype=jnp.float32)

    out = jax.block_until_ready(binary_loss(q, p, n, margin=1.0))
    ref = _reference(q, p, n, margin=1.0)
    assert out.shape == (B,)
    assert jnp.allclose(out, ref, rtol=1e-5, atol=1e-5), (out, ref)

    # Case 2: bf16 inputs (halved HBM traffic; kernel upcasts to f32 inside),
    # small non-multiple-of-8 batch and D < 128.
    B2, D2 = 12, 64
    q2 = jax.random.normal(k1, (B2, D2), dtype=jnp.bfloat16)
    p2 = jax.random.normal(k2, (B2, D2), dtype=jnp.bfloat16)
    n2 = jax.random.normal(k3, (B2, D2), dtype=jnp.bfloat16)

    out2 = jax.block_until_ready(binary_loss(q2, p2, n2, margin=1.0))
    ref2 = _reference(q2.astype(jnp.float32), p2.astype(jnp.float32),
                      n2.astype(jnp.float32), margin=1.0)
    assert out2.shape == (B2,)
    assert jnp.allclose(out2, ref2, rtol=1e-4, atol=1e-4), (out2, ref2)

    print("KERNEL_OK")
</pallas_src>

<mosaic_0001>
module attributes {stable_mosaic.version = 11 : i64} {
  func.func @_binary_loss_kernel(%arg0: i32, %arg1: memref<20x128xf32, #tpu.memory_space<vmem>>, %arg2: memref<20x128xf32, #tpu.memory_space<vmem>>, %arg3: memref<20x128xf32, #tpu.memory_space<vmem>>, %arg4: memref<20x1xf32, #tpu.memory_space<vmem>>) attributes {dimension_semantics = [#tpu.dimension_semantics<parallel>], iteration_bounds = array<i64: 1>, scalar_prefetch = 0 : i64, scratch_operands = 0 : i64, tpu.core_type = #tpu.core_type<tc>, window_params = [{transform_indices = @transform_0, window_bounds = array<i64: 20, 128>}, {transform_indices = @transform_1, window_bounds = array<i64: 20, 128>}, {transform_indices = @transform_2, window_bounds = array<i64: 20, 128>}, {transform_indices = @transform_3, window_bounds = array<i64: 20, 1>}]} {
    %c0 = arith.constant 0 : index
    %c0_0 = arith.constant 0 : index
    %0 = vector.load %arg1[%c0, %c0_0] : memref<20x128xf32, #tpu.memory_space<vmem>>, vector<20x128xf32>
    %c0_1 = arith.constant 0 : index
    %c0_2 = arith.constant 0 : index
    %1 = vector.load %arg2[%c0_1, %c0_2] : memref<20x128xf32, #tpu.memory_space<vmem>>, vector<20x128xf32>
    %c0_3 = arith.constant 0 : index
    %c0_4 = arith.constant 0 : index
    %2 = vector.load %arg3[%c0_3, %c0_4] : memref<20x128xf32, #tpu.memory_space<vmem>>, vector<20x128xf32>
    %3 = arith.subf %0, %1 : vector<20x128xf32>
    %cst = arith.constant 9.99999997E-7 : f32
    %4 = vector.broadcast %cst : f32 to vector<20x128xf32>
    %5 = arith.addf %3, %4 : vector<20x128xf32>
    %6 = arith.subf %0, %2 : vector<20x128xf32>
    %cst_5 = arith.constant 9.99999997E-7 : f32
    %7 = vector.broadcast %cst_5 : f32 to vector<20x128xf32>
    %8 = arith.addf %6, %7 : vector<20x128xf32>
    %9 = arith.mulf %5, %5 : vector<20x128xf32>
    %cst_6 = arith.constant dense<0.000000e+00> : vector<20xf32>
    %10 = vector.multi_reduction <add>, %9, %cst_6 [1] : vector<20x128xf32> to vector<20xf32>
    %11 = vector.shape_cast %10 : vector<20xf32> to vector<20x1xf32>
    %12 = arith.mulf %8, %8 : vector<20x128xf32>
    %cst_7 = arith.constant dense<0.000000e+00> : vector<20xf32>
    %13 = vector.multi_reduction <add>, %12, %cst_7 [1] : vector<20x128xf32> to vector<20xf32>
    %14 = vector.shape_cast %13 : vector<20xf32> to vector<20x1xf32>
    %15 = math.sqrt %14 : vector<20x1xf32>
    %cst_8 = arith.constant 1.000000e+00 : f32
    %16 = vector.broadcast %cst_8 : f32 to vector<20x1xf32>
    %17 = arith.subf %16, %15 : vector<20x1xf32>
    %cst_9 = arith.constant 0.000000e+00 : f32
    %18 = vector.broadcast %cst_9 : f32 to vector<20x1xf32>
    %19 = arith.maximumf %17, %18 : vector<20x1xf32>
    %20 = arith.mulf %19, %19 : vector<20x1xf32>
    %21 = arith.addf %11, %20 : vector<20x1xf32>
    %c0_10 = arith.constant 0 : index
    %c0_11 = arith.constant 0 : index
    %22 = vector.load %arg4[%c0_10, %c0_11] : memref<20x1xf32, #tpu.memory_space<vmem>>, vector<20x1xf32>
    tpu.vector_store %arg4[%c0_10, %c0_11], %21 {strides = array<i32>} : memref<20x1xf32, #tpu.memory_space<vmem>>, vector<20x1xf32>,
    return
  }
  func.func @transform_0(%arg0: i32) -> (i32, i32) {
    %c0_i32 = arith.constant 0 : i32
    %c0_i32_0 = arith.constant 0 : i32
    return %arg0, %c0_i32 : i32, i32
  }
  func.func @transform_1(%arg0: i32) -> (i32, i32) {
    %c0_i32 = arith.constant 0 : i32
    %c0_i32_0 = arith.constant 0 : i32
    return %arg0, %c0_i32 : i32, i32
  }
  func.func @transform_2(%arg0: i32) -> (i32, i32) {
    %c0_i32 = arith.constant 0 : i32
    %c0_i32_0 = arith.constant 0 : i32
    return %arg0, %c0_i32 : i32, i32
  }
  func.func @transform_3(%arg0: i32) -> (i32, i32) {
    %c0_i32 = arith.constant 0 : i32
    %c0_i32_0 = arith.constant 0 : i32
    return %arg0, %c0_i32 : i32, i32
  }
}

</mosaic_0001>

<bundles_post_ra>
// kernel: tpu_custom_call.1
= control target key start
LH: loop header
LB: loop body
LE: loop exit
PB: predicated region body
PF: predicated region fallthrough
CT: control target
= control target key end

     0   :  { %8 = vsyncpa [#allocation3], 0  ;;  %s294_s0 = inlined_call_operand.hbm [shape: f32[20,128], index: 0, kind: input, shape index: {}]   ;;  %s295_s1 = inlined_call_operand.hbm [shape: f32[20,128], index: 1, kind: input, shape index: {}]   ;;  %s296_s2 = inlined_call_operand.hbm [shape: f32[20,128], index: 2, kind: input, shape index: {}]   ;;  %s297_s3 = inlined_call_operand.vmem [shape: f32[20,1], index: 3, kind: output, shape index: {}]  }
   0x1   :  { %9 = vsyncpa [#allocation5], 0  ;;  %s27_s14 = sshll.u32 %s295_s1, 4  ;;  %s249_s15 = smov [#allocation4]   ;;  %s28_s14 = int_to_ptr.hbm [resolvable:$true] %s27_s14 }
   0x2   :  { %s29_s16 = sshll.u32 %s249_s15, 4  ;;  %s14_s19 = sshll.u32 %s294_s0, 4  ;;  %s30_s16 = int_to_ptr.vmem [resolvable:$true] %s29_s16  ;;  %s15_s19 = int_to_ptr.hbm [resolvable:$true] %s14_s19 }
   0x3   :  { %s250_s20 = smov 128   ;;  %s251_s21 = smov 8  }
   0x4   :  { %35 = dma.hbm_to_vmem [thread:$0]  %s28_s14, 384, %s30_s16, [#allocation5], %s250_s20, %s250_s20, %s251_s21  }
   0x5   :  { %s252_s22 = smov [#allocation2]   ;;  %s40_s26 = sshll.u32 %s296_s2, 4  ;;  %s41_s26 = int_to_ptr.hbm [resolvable:$true] %s40_s26 }
   0x6   :  { %s16_s23 = sshll.u32 %s252_s22, 4  ;;  %s253_s1 = smov [#allocation6]   ;;  %s17_s23 = int_to_ptr.vmem [resolvable:$true] %s16_s23 }
   0x7   :  { %22 = dma.hbm_to_vmem [thread:$0]  %s15_s19, 384, %s17_s23, [#allocation3], %s250_s20, %s250_s20, %s251_s21  }
   0x8   :  { %s42_s27 = sshll.u32 %s253_s1, 4  ;;  %s43_s27 = int_to_ptr.vmem [resolvable:$true] %s42_s27 }
   0x9   :  { %48 = dma.hbm_to_vmem [thread:$0]  %s41_s26, 384, %s43_s27, [#allocation5], %s250_s20, %s250_s20, %s251_s21  }
   0xa   :  { %245 = dma.done.wait [#allocation3], 384  }
   0xb   :  { %246 = vsyncadd [#allocation3], 4294966912 }
   0xc   :  { %247 = dma.done.wait [#allocation5], 768  }
   0xd   :  { %248 = vsyncadd [#allocation5], 4294966528  ;;  %v61_v0 = vld [vmem:[#allocation2] sm:$0xff]  ;;  %v67_v1 = vld [vmem:[#allocation6] sm:$0xff]  ;;  %vm89_vm0 = vcmask 1043456   ;;  %vm151_vm5 = vcmask 7168  }
   0xe   :  { %v63_v2 = vld [vmem:[#allocation2 + $0x10] sm:$0xf]  ;;  %v76_v3 = vsub.f32 %v61_v0, %v67_v1  ;;  %v69_v4 = vld [vmem:[#allocation6 + $0x10] sm:$0xf]  ;;  %v62_v5 = vld [vmem:[#allocation2 + $0x8] sm:$0xff]  ;;  %vm154_vm8 = vcmask 3072  }
   0xf   :  { %v68_v6 = vld [vmem:[#allocation6 + $0x8] sm:$0xff]  ;;  %v78_v7 = vsub.f32 %v63_v2, %v69_v4  ;;  %v65_v8 = vld [vmem:[#allocation4 + $0x8] sm:$0xff]  ;;  %v66_v10 = vld [vmem:[#allocation4 + $0x10] sm:$0xf] }
  0x10   :  { %v64_v9 = vld [vmem:[#allocation4] sm:$0xff]  ;;  %v79_v11 = vadd.f32 1e-06, %v76_v3  ;;  %v77_v12 = vsub.f32 %v62_v5, %v68_v6  ;;  %v71_v13 = vsub.f32 %v62_v5, %v65_v8  ;;  %v72_v14 = vsub.f32 %v63_v2, %v66_v10 }
  0x11   :  { %v81_v15 = vadd.f32 1e-06, %v78_v7  ;;  %v70_v18 = vsub.f32 %v61_v0, %v64_v9 }
  0x12   :  { %v93_v16 = vmul.f32 %v79_v11, %v79_v11  ;;  %v74_v17 = vadd.f32 1e-06, %v71_v13  ;;  %v75_v20 = vadd.f32 1e-06, %v72_v14  ;;  %v80_v21 = vadd.f32 1e-06, %v77_v12 }
  0x13   :  { %v95_v19 = vmul.f32 %v81_v15, %v81_v15  ;;  %v73_v24 = vadd.f32 1e-06, %v70_v18 }
  0x14   :  { %96 = vadd.xlane.f32.xlu0 %v93_v16  ;;  %v83_v22 = vmul.f32 %v74_v17, %v74_v17  ;;  %v84_v25 = vmul.f32 %v75_v20, %v75_v20  ;;  %v94_v26 = vmul.f32 %v80_v21, %v80_v21 }
  0x15   :  { %v100_v23 = vsel %vm89_vm0, %v95_v19, 0.0  ;;  %v82_v27 = vmul.f32 %v73_v24, %v73_v24 }
  0x16   :  { %101 = vadd.xlane.f32.xlu1 %v100_v23  ;;  %87 = vadd.xlane.f32.xlu2 %v83_v22  ;;  %v90_v28 = vsel %vm89_vm0, %v84_v25, 0.0 }
  0x1c   :  { %98 = vadd.xlane.f32.xlu0 %v94_v26 }
  0x1e   :  { %85 = vadd.xlane.f32.xlu1 %v82_v27  ;;  %91 = vadd.xlane.f32.xlu2 %v90_v28 }
  0x87   :  { %v97_v29 = vpop.xlane.xlu0 %96 }
  0x88   :  { %167 = vrsqrt.f32 %v97_v29  ;;  %vm110_vm1 = vcmp.eq.f32.partialorder %v97_v29, inf  ;;  %v113_v49 = vand.u32 2147483648, %v97_v29  ;;  %vm112_vm2 = vcmp.eq.f32.partialorder %v97_v29, 0.0 }
  0x89   :  { %v102_v30 = vpop.xlane.xlu1 %101  ;;  %v88_v45 = vpop.xlane.xlu2 %87 }
  0x8a   :  { %169 = vrsqrt.f32 %v102_v30  ;;  %vm134_vm3 = vcmp.eq.f32.partialorder %v102_v30, inf  ;;  %v137_v54 = vand.u32 2147483648, %v102_v30  ;;  %vm136_vm4 = vcmp.eq.f32.partialorder %v102_v30, 0.0 }
  0x8e   :  { %v168_v31 = vpop.eup %167 }
  0x8f   :  { %v104_v32 = vmul.f32 %v168_v31, %v97_v29  ;;  %v99_v33 = vpop.xlane.xlu0 %98 }
  0x90   :  { %v170_v34 = vpop.eup %169  ;;  %171 = vrsqrt.f32 %v99_v33  ;;  %vm122_vm6 = vcmp.eq.f32.partialorder %v99_v33, inf  ;;  %v125_v2 = vand.u32 2147483648, %v99_v33  ;;  %vm124_vm7 = vcmp.eq.f32.partialorder %v99_v33, 0.0 }
  0x91   :  { %v128_v35 = vmul.f32 %v170_v34, %v102_v30  ;;  %v105_v36 = vmul.f32 %v168_v31, %v104_v32  ;;  %v86_v62 = vpop.xlane.xlu1 %85  ;;  %v92_v3 = vpop.xlane.xlu2 %91 }
  0x93   :  { %v106_v37 = vmul.f32 0.5, %v105_v36  ;;  %v129_v38 = vmul.f32 %v170_v34, %v128_v35 }
  0x95   :  { %v107_v39 = vsub.f32 1.5, %v106_v37  ;;  %v130_v40 = vmul.f32 0.5, %v129_v38 }
  0x96   :  { %v172_v41 = vpop.eup %171 }
  0x97   :  { %v116_v42 = vmul.f32 %v172_v41, %v99_v33  ;;  %v108_v43 = vmul.f32 %v168_v31, %v107_v39  ;;  %v131_v44 = vsub.f32 1.5, %v130_v40 }
  0x99   :  { %v117_v46 = vmul.f32 %v172_v41, %v116_v42  ;;  %v109_v47 = vmul.f32 %v108_v43, %v97_v29  ;;  %v132_v48 = vmul.f32 %v170_v34, %v131_v44 }
  0x9b   :  { %v118_v50 = vmul.f32 0.5, %v117_v46  ;;  %v111_v51 = vsel %vm110_vm1, %v97_v29, %v109_v47  ;;  %v133_v52 = vmul.f32 %v132_v48, %v102_v30 }
  0x9c   :  { %v114_v53 = vsel %vm112_vm2, %v113_v49, %v111_v51 }
  0x9d   :  { %v119_v55 = vsub.f32 1.5, %v118_v50  ;;  %v139_v56 = vsub.f32 1.0, %v114_v53  ;;  %v135_v57 = vsel %vm134_vm3, %v102_v30, %v133_v52 }
  0x9e   :  { %v138_v58 = vsel %vm136_vm4, %v137_v54, %v135_v57 }
  0x9f   :  { %v120_v59 = vmul.f32 %v172_v41, %v119_v55  ;;  %v142_v60 = vmax.f32 %v139_v56, 0.0  ;;  %v141_v61 = vsub.f32 1.0, %v138_v58 }
  0xa1   :  { %v121_v63 = vmul.f32 %v120_v59, %v99_v33  ;;  %v145_v0 = vmul.f32 %v142_v60, %v142_v60  ;;  %v144_v1 = vmax.f32 %v141_v61, 0.0 }
  0xa3   :  { %v123_v4 = vsel %vm122_vm6, %v99_v33, %v121_v63  ;;  %v148_v5 = vadd.f32 %v145_v0, %v86_v62  ;;  %v147_v6 = vmul.f32 %v144_v1, %v144_v1 }
  0xa4   :  { %v126_v7 = vsel %vm124_vm7, %v125_v2, %v123_v4 }
  0xa5   :  { %v140_v8 = vsub.f32 1.0, %v126_v7  ;;  %152 = vst.msk [vmem:[%s297_s3] sm:$0xff] %vm151_vm5, %v148_v5  ;;  %v150_v9 = vadd.f32 %v147_v6, %v92_v3 }
  0xa7   :  { %v143_v10 = vmax.f32 %v140_v8, 0.0  ;;  %155 = vst.msk [vmem:[%s297_s3 + $0x10] sm:$0xf] %vm154_vm8, %v150_v9 }
  0xa9   :  { %v146_v11 = vmul.f32 %v143_v10, %v143_v10 }
  0xab   :  { %v149_v12 = vadd.f32 %v146_v11, %v88_v45 }
  0xad   :  { %153 = vst.msk [vmem:[%s297_s3 + $0x8] sm:$0xff] %vm151_vm5, %v149_v12 }
  0xae   :  { %160 = vsyncpa [#allocation3], 1 }
  0xaf   :  { %161 = vsyncpa [#allocation5], 1 }

</bundles_post_ra>
